<compile_context>
chip_gen: v7x
topology: tpu7x:2x2x1
jax: 0.10.0
libtpu: 0.0.40
codegen_flags: <defaults>
</compile_context>

<pallas_src>
import numpy as np
import jax
import jax.numpy as jnp
from jax.experimental import pallas as pl
from jax.experimental.pallas import tpu as pltpu

N = 16          # nodes per graph
F_IN = 32       # in_features
F_OUT = 16      # out_features
ALPHA = 0.2     # LeakyReLU negative slope
DROPOUT = 0.6   # unused in eval mode
NEG_INF = -9000000000000000.0

B = 32          # graphs per call (batch)
G = 8           # graphs per grid step -> G*N = 128 (lane-dense block)
GN = G * N      # 128
assert B % G == 0
NUM_BLOCKS = B // G


def gat_kernel(h_ref, ht_ref, w_ref, wt_ref, asrc_ref, adst_ref, maskT_ref,
               outT_ref):
    h = h_ref[...]            # (GN, F_IN)    G graphs stacked row-wise
    hT = ht_ref[...]          # (F_IN, GN)    same data, transposed on host
    W = w_ref[...]            # (F_IN, F_OUT) shared weight
    WT = wt_ref[...]          # (F_OUT, F_IN)
    a_src = asrc_ref[...]     # (1, F_OUT)    == a[:F_OUT].T
    a_dst = adst_ref[...]     # (1, F_OUT)    == a[F_OUT:].T
    maskT = maskT_ref[...]    # (GN, GN)      maskT[j, i] = (adj_norm[i, j] > 0)

    # Wh in both orientations; two tiny MXU matmuls, avoids any in-kernel transpose.
    WhT = jnp.dot(WT, hT, preferred_element_type=jnp.float32)   # (F_OUT, GN)
    Wh = jnp.dot(h, W, preferred_element_type=jnp.float32)      # (GN, F_OUT)

    # e^T[j, i] = LeakyReLU(Wh[i]·a_src + Wh[j]·a_dst)
    f_src = jnp.dot(a_src, WhT, preferred_element_type=jnp.float32)  # (1, GN)  by i
    f_dst = jnp.sum(Wh * a_dst, axis=1, keepdims=True)               # (GN, 1)  by j
    eT = f_dst + f_src                                               # (GN, GN)
    eT = jnp.where(eT > 0, eT, ALPHA * eT)                           # LeakyReLU

    # masked softmax over j (axis 0 in this orientation); non-edges and
    # cross-graph entries -> exactly 0 after exp.
    logits = jnp.where(maskT > 0, eT, jnp.float32(NEG_INF))
    logits = logits - jnp.max(logits, axis=0, keepdims=True)
    p = jnp.exp(logits)
    inv = 1.0 / jnp.sum(p, axis=0, keepdims=True)                    # (1, GN)
    attT = p * inv
    # dropout: identity (eval mode)

    # h'^T = Wh^T @ att^T ; ELU (concat=True branch); lane-dense (F_OUT, GN) store.
    hpT = jnp.dot(WhT, attT, preferred_element_type=jnp.float32)     # (F_OUT, GN)
    outT_ref[...] = jnp.where(hpT > 0, hpT,
                              jnp.exp(jnp.minimum(hpT, 0.0)) - 1.0)


@jax.jit
def gat_forward_batched(h_flat, W, a, maskT_2d):
    """h_flat: (B*N, F_IN); maskT_2d: (B*N, GN) transposed block-diag mask per slab.

    Returns (B*N, F_OUT) in the standard row-major node layout."""
    a_src = a[:F_OUT, 0].reshape(1, F_OUT)
    a_dst = a[F_OUT:, 0].reshape(1, F_OUT)
    hT = h_flat.T          # (F_IN, B*N)  lane-dense load layout
    WT = W.T               # (F_OUT, F_IN)
    outT = pl.pallas_call(
        gat_kernel,
        out_shape=jax.ShapeDtypeStruct((F_OUT, B * N), jnp.float32),
        grid=(NUM_BLOCKS,),
        in_specs=[
            pl.BlockSpec((GN, F_IN), lambda b: (b, 0)),      # h slab
            pl.BlockSpec((F_IN, GN), lambda b: (0, b)),      # h^T slab (lane dense)
            pl.BlockSpec((F_IN, F_OUT), lambda b: (0, 0)),   # W   (shared, resident)
            pl.BlockSpec((F_OUT, F_IN), lambda b: (0, 0)),   # W^T (shared, resident)
            pl.BlockSpec((1, F_OUT), lambda b: (0, 0)),      # a_src
            pl.BlockSpec((1, F_OUT), lambda b: (0, 0)),      # a_dst
            pl.BlockSpec((GN, GN), lambda b: (b, 0)),        # transposed edge mask
        ],
        out_specs=pl.BlockSpec((F_OUT, GN), lambda b: (0, b)),  # lane-dense store
        compiler_params=pltpu.CompilerParams(
            dimension_semantics=("parallel",)),
    )(h_flat, hT, W, WT, a_src, a_dst, maskT_2d)
    return outT.T          # restore (B*N, F_OUT) layout (tiny wrapper transpose)


# ---------------- host-side glue + pure-JAX reference ----------------

def normalization_np(Mat):
    """Exactly the reference numpy normalization: D^-1/2 (A+I) D^-1/2."""
    I = np.eye(Mat.shape[0])
    Mat = Mat + I
    degree = np.array(Mat.sum(1))
    d_hat = np.diag(np.power(degree, -0.5).flatten())
    return d_hat.dot(Mat).dot(d_hat)


def gat_reference_single(h, W, a, adj_norm):
    """Pure-JAX mirror of the PyTorch forward (eval mode) for one graph."""
    Wh = h @ W
    a_src, a_dst = a[:F_OUT, 0], a[F_OUT:, 0]
    e = (Wh @ a_src)[:, None] + (Wh @ a_dst)[None, :]
    e = jnp.where(e > 0, e, ALPHA * e)
    att = jnp.where(adj_norm > 0, e, jnp.float32(NEG_INF))
    att = jax.nn.softmax(att, axis=1)
    h_prime = att @ Wh
    return jax.nn.elu(h_prime)


def xavier_uniform(key, shape, gain):
    fan_in, fan_out = shape[0], shape[1]
    bound = gain * np.sqrt(6.0 / (fan_in + fan_out))
    return jax.random.uniform(key, shape, jnp.float32, -bound, bound)


if __name__ == "__main__":
    key = jax.random.PRNGKey(0)
    k_h, k_adj, k_w, k_a, k_mc = jax.random.split(key, 5)

    # deterministic parameters (shapes from __init__)
    W = xavier_uniform(k_w, (F_IN, F_OUT), gain=1.414)
    a = xavier_uniform(k_a, (2 * F_OUT, 1), gain=1.414)

    # deterministic batched inputs
    h_all = jax.random.normal(k_h, (B, N, F_IN), jnp.float32)
    adj_raw = (jax.random.uniform(k_adj, (B, N, N)) > 0.5).astype(jnp.float32)
    adj_raw = jnp.maximum(adj_raw, jnp.swapaxes(adj_raw, 1, 2))  # symmetric

    # --- host glue replicating the motif-count + normalization block (numpy,
    #     exactly as the PyTorch forward does on CPU; MC file synthesized) ---
    MC = np.asarray(jax.random.uniform(k_mc, (36,)))     # synthetic motif counts
    tor_M = np.zeros((36, N, N), dtype=np.float64)       # zeros, as in reference
    MC_index = np.argsort(MC)
    adj_raw_np = np.asarray(adj_raw, dtype=np.float64)
    adj_norm = np.zeros((B, N, N), dtype=np.float64)
    for b in range(B):
        adjacency = adj_raw_np[b].copy()
        for i in range(4):
            adjacency = adjacency + tor_M[MC_index[-i - 1]]   # no-op (zeros)
        adj_norm[b] = normalization_np(adjacency)

    # edge mask (all the kernel needs), packed block-diagonally so each grid step
    # handles G graphs as one lane-dense 128-node attention problem.  Built in the
    # transposed [j, i] orientation used by the kernel (adj_norm is symmetric, but
    # the explicit .T keeps the semantics exact).
    masks = (adj_norm > 0).astype(np.float32)             # (B, N, N)
    maskT_2d = np.zeros((B * N, GN), dtype=np.float32)
    for b in range(B):
        _, g = divmod(b, G)
        maskT_2d[b * N:(b + 1) * N, g * N:(g + 1) * N] = masks[b].T
    maskT_2d = jnp.asarray(maskT_2d)

    h_flat = h_all.reshape(B * N, F_IN)

    out = gat_forward_batched(h_flat, W, a, maskT_2d)
    out = jax.block_until_ready(out)
    out = out.reshape(B, N, F_OUT)

    adj_norm_j = jnp.asarray(adj_norm, jnp.float32)
    ref = jax.vmap(lambda hh, aa: gat_reference_single(hh, W, a, aa))(
        h_all, adj_norm_j)

    np.testing.assert_allclose(np.asarray(out), np.asarray(ref),
                               rtol=1e-4, atol=1e-4)
    print("KERNEL_OK")
</pallas_src>

<mosaic_0001>
module attributes {stable_mosaic.version = 11 : i64} {
  func.func @gat_kernel(%arg0: i32, %arg1: memref<128x32xf32, #tpu.memory_space<vmem>>, %arg2: memref<32x128xf32, #tpu.memory_space<vmem>>, %arg3: memref<32x16xf32, #tpu.memory_space<vmem>>, %arg4: memref<16x32xf32, #tpu.memory_space<vmem>>, %arg5: memref<1x16xf32, #tpu.memory_space<vmem>>, %arg6: memref<1x16xf32, #tpu.memory_space<vmem>>, %arg7: memref<128x128xf32, #tpu.memory_space<vmem>>, %arg8: memref<16x128xf32, #tpu.memory_space<vmem>>) attributes {dimension_semantics = [#tpu.dimension_semantics<parallel>], iteration_bounds = array<i64: 4>, scalar_prefetch = 0 : i64, scratch_operands = 0 : i64, tpu.core_type = #tpu.core_type<tc>, window_params = [{transform_indices = @transform_0, window_bounds = array<i64: 128, 32>}, {transform_indices = @transform_1, window_bounds = array<i64: 32, 128>}, {pipeline_mode = #tpu.pipeline_mode<synchronous>, transform_indices = @transform_2, window_bounds = array<i64: 32, 16>}, {pipeline_mode = #tpu.pipeline_mode<synchronous>, transform_indices = @transform_3, window_bounds = array<i64: 16, 32>}, {pipeline_mode = #tpu.pipeline_mode<synchronous>, transform_indices = @transform_4, window_bounds = array<i64: 1, 16>}, {pipeline_mode = #tpu.pipeline_mode<synchronous>, transform_indices = @transform_5, window_bounds = array<i64: 1, 16>}, {transform_indices = @transform_6, window_bounds = array<i64: 128, 128>}, {transform_indices = @transform_7, window_bounds = array<i64: 16, 128>}]} {
    %c0 = arith.constant 0 : index
    %c0_0 = arith.constant 0 : index
    %0 = vector.load %arg1[%c0, %c0_0] : memref<128x32xf32, #tpu.memory_space<vmem>>, vector<128x32xf32>
    %c0_1 = arith.constant 0 : index
    %c0_2 = arith.constant 0 : index
    %1 = vector.load %arg2[%c0_1, %c0_2] : memref<32x128xf32, #tpu.memory_space<vmem>>, vector<32x128xf32>
    %c0_3 = arith.constant 0 : index
    %c0_4 = arith.constant 0 : index
    %2 = vector.load %arg3[%c0_3, %c0_4] : memref<32x16xf32, #tpu.memory_space<vmem>>, vector<32x16xf32>
    %c0_5 = arith.constant 0 : index
    %c0_6 = arith.constant 0 : index
    %3 = vector.load %arg4[%c0_5, %c0_6] : memref<16x32xf32, #tpu.memory_space<vmem>>, vector<16x32xf32>
    %c0_7 = arith.constant 0 : index
    %c0_8 = arith.constant 0 : index
    %4 = vector.load %arg5[%c0_7, %c0_8] : memref<1x16xf32, #tpu.memory_space<vmem>>, vector<1x16xf32>
    %c0_9 = arith.constant 0 : index
    %c0_10 = arith.constant 0 : index
    %5 = vector.load %arg6[%c0_9, %c0_10] : memref<1x16xf32, #tpu.memory_space<vmem>>, vector<1x16xf32>
    %c0_11 = arith.constant 0 : index
    %c0_12 = arith.constant 0 : index
    %6 = vector.load %arg7[%c0_11, %c0_12] : memref<128x128xf32, #tpu.memory_space<vmem>>, vector<128x128xf32>
    %cst = arith.constant dense<0.000000e+00> : vector<16x128xf32>
    %7 = tpu.matmul %3, %1, %cst {dimension_numbers = #tpu.dot_dimension_numbers<[1], [0], [0], [1], [0, 0, 1, 1], [], []>} : vector<16x32xf32>, vector<32x128xf32>, vector<16x128xf32> -> vector<16x128xf32>
    %cst_13 = arith.constant dense<0.000000e+00> : vector<128x16xf32>
    %8 = tpu.matmul %0, %2, %cst_13 {dimension_numbers = #tpu.dot_dimension_numbers<[1], [0], [0], [1], [0, 0, 1, 1], [], []>} : vector<128x32xf32>, vector<32x16xf32>, vector<128x16xf32> -> vector<128x16xf32>
    %cst_14 = arith.constant dense<0.000000e+00> : vector<1x128xf32>
    %9 = tpu.matmul %4, %7, %cst_14 {dimension_numbers = #tpu.dot_dimension_numbers<[1], [0], [0], [1], [0, 0, 1, 1], [], []>} : vector<1x16xf32>, vector<16x128xf32>, vector<1x128xf32> -> vector<1x128xf32>
    %10 = vector.broadcast %5 : vector<1x16xf32> to vector<128x16xf32>
    %11 = arith.mulf %8, %10 : vector<128x16xf32>
    %cst_15 = arith.constant dense<0.000000e+00> : vector<128xf32>
    %12 = vector.multi_reduction <add>, %11, %cst_15 [1] : vector<128x16xf32> to vector<128xf32>
    %13 = vector.shape_cast %12 : vector<128xf32> to vector<128x1xf32>
    %14 = vector.broadcast %13 : vector<128x1xf32> to vector<128x128xf32>
    %15 = vector.broadcast %9 : vector<1x128xf32> to vector<128x128xf32>
    %16 = arith.addf %14, %15 : vector<128x128xf32>
    %cst_16 = arith.constant 0.000000e+00 : f32
    %17 = vector.broadcast %cst_16 : f32 to vector<128x128xf32>
    %18 = arith.cmpf ogt, %16, %17 : vector<128x128xf32>
    %cst_17 = arith.constant 2.000000e-01 : f32
    %19 = vector.broadcast %cst_17 : f32 to vector<128x128xf32>
    %20 = arith.mulf %19, %16 : vector<128x128xf32>
    %21 = arith.select %18, %16, %20 : vector<128x128xi1>, vector<128x128xf32>
    %cst_18 = arith.constant 0.000000e+00 : f32
    %22 = vector.broadcast %cst_18 : f32 to vector<128x128xf32>
    %23 = arith.cmpf ogt, %6, %22 : vector<128x128xf32>
    %cst_19 = arith.constant -9.000000e+15 : f32
    %24 = vector.broadcast %cst_19 : f32 to vector<128x128xf32>
    %25 = arith.select %23, %21, %24 : vector<128x128xi1>, vector<128x128xf32>
    %cst_20 = arith.constant dense<0xFF800000> : vector<128xf32>
    %26 = vector.multi_reduction <maximumf>, %25, %cst_20 [0] : vector<128x128xf32> to vector<128xf32>
    %27 = vector.shape_cast %26 : vector<128xf32> to vector<1x128xf32>
    %28 = vector.broadcast %27 : vector<1x128xf32> to vector<128x128xf32>
    %29 = arith.subf %25, %28 : vector<128x128xf32>
    %30 = math.exp %29 : vector<128x128xf32>
    %cst_21 = arith.constant dense<0.000000e+00> : vector<128xf32>
    %31 = vector.multi_reduction <add>, %30, %cst_21 [0] : vector<128x128xf32> to vector<128xf32>
    %32 = vector.shape_cast %31 : vector<128xf32> to vector<1x128xf32>
    %cst_22 = arith.constant 1.000000e+00 : f32
    %33 = vector.broadcast %cst_22 : f32 to vector<1x128xf32>
    %34 = arith.divf %33, %32 : vector<1x128xf32>
    %35 = vector.broadcast %34 : vector<1x128xf32> to vector<128x128xf32>
    %36 = arith.mulf %30, %35 : vector<128x128xf32>
    %cst_23 = arith.constant dense<0.000000e+00> : vector<16x128xf32>
    %37 = tpu.matmul %7, %36, %cst_23 {dimension_numbers = #tpu.dot_dimension_numbers<[1], [0], [0], [1], [0, 0, 1, 1], [], []>} : vector<16x128xf32>, vector<128x128xf32>, vector<16x128xf32> -> vector<16x128xf32>
    %cst_24 = arith.constant 0.000000e+00 : f32
    %38 = vector.broadcast %cst_24 : f32 to vector<16x128xf32>
    %39 = arith.cmpf ogt, %37, %38 : vector<16x128xf32>
    %cst_25 = arith.constant 0.000000e+00 : f32
    %40 = vector.broadcast %cst_25 : f32 to vector<16x128xf32>
    %41 = arith.minimumf %37, %40 : vector<16x128xf32>
    %42 = math.exp %41 : vector<16x128xf32>
    %cst_26 = arith.constant 1.000000e+00 : f32
    %43 = vector.broadcast %cst_26 : f32 to vector<16x128xf32>
    %44 = arith.subf %42, %43 : vector<16x128xf32>
    %45 = arith.select %39, %37, %44 : vector<16x128xi1>, vector<16x128xf32>
    %c0_27 = arith.constant 0 : index
    %c0_28 = arith.constant 0 : index
    %46 = vector.load %arg8[%c0_27, %c0_28] : memref<16x128xf32, #tpu.memory_space<vmem>>, vector<16x128xf32>
    tpu.vector_store %arg8[%c0_27, %c0_28], %45 {strides = array<i32>} : memref<16x128xf32, #tpu.memory_space<vmem>>, vector<16x128xf32>,
    return
  }
  func.func @transform_0(%arg0: i32) -> (i32, i32) {
    %c0_i32 = arith.constant 0 : i32
    %c0_i32_0 = arith.constant 0 : i32
    return %arg0, %c0_i32 : i32, i32
  }
  func.func @transform_1(%arg0: i32) -> (i32, i32) {
    %c0_i32 = arith.constant 0 : i32
    %c0_i32_0 = arith.constant 0 : i32
    return %c0_i32, %arg0 : i32, i32
  }
  func.func @transform_2(%arg0: i32) -> (i32, i32) {
    %c0_i32 = arith.constant 0 : i32
    %c0_i32_0 = arith.constant 0 : i32
    %c0_i32_1 = arith.constant 0 : i32
    return %c0_i32, %c0_i32_0 : i32, i32
  }
  func.func @transform_3(%arg0: i32) -> (i32, i32) {
    %c0_i32 = arith.constant 0 : i32
    %c0_i32_0 = arith.constant 0 : i32
    %c0_i32_1 = arith.constant 0 : i32
    return %c0_i32, %c0_i32_0 : i32, i32
  }
  func.func @transform_4(%arg0: i32) -> (i32, i32) {
    %c0_i32 = arith.constant 0 : i32
    %c0_i32_0 = arith.constant 0 : i32
    %c0_i32_1 = arith.constant 0 : i32
    return %c0_i32, %c0_i32_0 : i32, i32
  }
  func.func @transform_5(%arg0: i32) -> (i32, i32) {
    %c0_i32 = arith.constant 0 : i32
    %c0_i32_0 = arith.constant 0 : i32
    %c0_i32_1 = arith.constant 0 : i32
    return %c0_i32, %c0_i32_0 : i32, i32
  }
  func.func @transform_6(%arg0: i32) -> (i32, i32) {
    %c0_i32 = arith.constant 0 : i32
    %c0_i32_0 = arith.constant 0 : i32
    return %arg0, %c0_i32 : i32, i32
  }
  func.func @transform_7(%arg0: i32) -> (i32, i32) {
    %c0_i32 = arith.constant 0 : i32
    %c0_i32_0 = arith.constant 0 : i32
    return %c0_i32, %arg0 : i32, i32
  }
}

</mosaic_0001>

<bundles_post_ra>
// kernel: gat_forward_batched.1
= control target key start
LH: loop header
LB: loop body
LE: loop exit
PB: predicated region body
PF: predicated region fallthrough
CT: control target
= control target key end

     0   :  { %12 = vsyncpa [#allocation4], 0  ;;  %s2053_s0 = inlined_call_operand.vmem [shape: f32[512,32], index: 0, kind: input, shape index: {}]   ;;  %s2054_s1 = inlined_call_operand.vmem [shape: f32[32,512], index: 1, kind: input, shape index: {}]   ;;  %s2055_s2 = inlined_call_operand.vmem [shape: f32[32,16], index: 2, kind: input, shape index: {}]   ;;  %s2056_s3 = inlined_call_operand.vmem [shape: f32[16,32], index: 3, kind: input, shape index: {}]   ;;  %s2057_s4 = inlined_call_operand.vmem [shape: f32[1,16], index: 4, kind: input, shape index: {}]   ;;  %s2058_s5 = inlined_call_operand.vmem [shape: f32[1,16], index: 5, kind: input, shape index: {}]   ;;  %s2059_s6 = inlined_call_operand.vmem [shape: f32[512,128], index: 6, kind: input, shape index: {}]   ;;  %s2060_s7 = inlined_call_operand.hbm [shape: f32[16,512], index: 7, kind: output, shape index: {}]  }
   0x1   :  { %14 = vsyncpa [#allocation4 + $0x1], 0  ;;  %s1647_s24 = smov 0   ;;  %s1649_s25 = smov 0  }
   0x2   :  { %s1651_s26 = smov 0   ;;  %s1653_s27 = smov 0  }
   0x3 LB: > { %s1668_s28 = sadd.s32 4294967295, %s1598_s27   ;;  %s1232_s29 = sadd.s32 4294967294, %s1598_s27   ;;  %s1598_s27 = sphi %s1653_s27, %s2074_s27   ;;  %s1594_s26 = sphi %s1651_s26, %s2073_s26   ;;  %s1590_s25 = sphi %s1649_s25, %s2072_s25   ;;  %s1586_s24 = sphi %s1647_s24, %s2071_s24  }
   0x4   : > { %s1672_s30 = sadd.s32 1, %s1598_s27   ;;  %s53_s8 = sadd.s32 1, %s1594_s26 }
   0x5   : > { %s50_s9 = ssub.s32 %s1598_s27, %s1672_s30  ;;  %p60_p0 = scmp.ne.s32.totalorder %s1594_s26, %s1590_s25 }
   0x6   : > { %p51_p1 = scmp.eq.s32.totalorder %s50_s9, 0  ;;  %p61_p2 = scmp.eq.s32.totalorder %s1598_s27, 0 }
   0x7   : > { %p200_p3 = scmp.eq.s32.totalorder %s1668_s28, 3  ;;  %p205_p4 = scmp.ne.s32.totalorder %s1590_s25, %s1586_s24 }
   0x8   : > { %s1684_s10 = scalar_select %p51_p1, %s1594_s26, %s53_s8  }
   0x9   : > { %p62_p5 = por %p61_p2, %p60_p0  ;;  %p1686_p6 = por %p200_p3, %p60_p0 }
   0xa   : > { %p206_p7 = scmp.eq.s32.totalorder %s1232_s29, 3  ;;  %p1234_p9 = scmp.ge.s32.totalorder %s1598_s27, 4 }
   0xc   : > { %p1690_p8 = por %p206_p7, %p205_p4  ;;  %234 = sbr.rel (%p1234_p9) target bundleno = 27 (0x1b), region = 32 }
  0x13   : > { %246 = sbr.rel (!%p62_p5) target bundleno = 27 (0x1b), region = 40  ;;  %s248_s13 = sand.u32 (%p62_p5), 1, %s1594_s26  }
  0x14   : > { %s1236_s14 = sshll.u32 (%p62_p5), %s1598_s27, 3  ;;  %s1235_s15 = sshll.u32 (%p62_p5), %s248_s13, 5 }
  0x15   : > { %s252_s18 = scalar_lea.vmem (%p62_p5), %s2054_s1, %s1236_s14  ;;  %s250_s19 = scalar_lea.vmem (%p62_p5), [#allocation2], %s1235_s15 }
  0x16   : > { %v286_v0 = vld [vmem:[%s252_s18] sm:$0xff] (%p62_p5) }
  0x17   : > { %v288_v1 = vld [vmem:[%s252_s18 + $0x20] sm:$0xff] (%p62_p5)  ;;  %287 = vst [vmem:[%s250_s19] sm:$0xff] (%p62_p5), %v286_v0 }
  0x18   : > { %v290_v2 = vld [vmem:[%s252_s18 + $0x40] sm:$0xff] (%p62_p5)  ;;  %289 = vst [vmem:[%s250_s19 + $0x8] sm:$0xff] (%p62_p5), %v288_v1 }
  0x19   : > { %291 = vst [vmem:[%s250_s19 + $0x10] sm:$0xff] (%p62_p5), %v290_v2  ;;  %v292_v3 = vld [vmem:[%s252_s18 + $0x60] sm:$0xff] (%p62_p5) }
  0x1a   : > { %293 = vst [vmem:[%s250_s19 + $0x18] sm:$0xff] %v292_v3 }
  0x1b PF: > { %p1237_p10 = scmp.ge.s32.totalorder %s1598_s27, 1  ;;  %p307_p11 = scmp.lt.s32.totalorder %s1598_s27, 5 }
  0x1d   : > { %p308_p12 = pnand %p1237_p10, %p307_p11 }
  0x1e   : > { %s1703_s20 = sand.u32 (!%p308_p12), 1, %s1590_s25   ;;  %v391_v4 = vld [vmem:[%s2056_s3] sm:$0xff] (!%p308_p12)  ;;  %vm411_vm0 = vcmask (!%p308_p12), 261120   ;;  %s1240_s8 = sshll.u32 (!%p308_p12), %s1668_s28, 4  ;;  %v388_v6 = vld [vmem:[%s2055_s2 + $0x8] sm:$0xff] (!%p308_p12)  ;;  %v389_v7 = vld [vmem:[%s2055_s2 + $0x10] sm:$0xff] (!%p308_p12) }
  0x1f   : > { %311 = sbr.rel (%p308_p12) target bundleno = 877 (0x36d), region = 82  ;;  %v387_v5 = vld [vmem:[%s2055_s2] sm:$0xff] (!%p308_p12)  ;;  %s1238_s9 = sshll.u32 (!%p308_p12), %s1703_s20, 5  ;;  %1325 = vmatprep.mubr.msk.f32.mxu0 (!%p308_p12), %vm411_vm0, %v391_v4  ;;  %v390_v8 = vld [vmem:[%s2055_s2 + $0x18] sm:$0xff] (!%p308_p12)  ;;  %v392_v20 = vld [vmem:[%s2056_s3 + $0x8] sm:$0xff] (!%p308_p12)  ;;  %v1600_v34 = vmov (!%p308_p12), 0.0|0.0  }
  0x20   : > { %v1410_v9 = vpack.c.bf16 (!%p308_p12), %v388_v6, %v387_v5  ;;  %v1414_v10 = vpack.c.bf16 (!%p308_p12), %v390_v8, %v389_v7  ;;  %p356_p13 = scmp.lt.s32.totalorder (!%p308_p12), %s1240_s8, 63  ;;  %s316_s19 = scalar_lea.vmem (!%p308_p12), [#allocation2], %s1238_s9  ;;  %vm1601_vm1 = vmmov (!%p308_p12), 0   ;;  %v1602_v35 = vmov (!%p308_p12), 0.0   ;;  %v1772_v36 = vld [vmem:[%s2058_s5] ss:$0 sm:$0xff] (!%p308_p12) }
  0x21   : > { %v383_v11 = vld [vmem:[%s316_s19] sm:$0xff] (!%p308_p12)  ;;  %v384_v12 = vld [vmem:[%s316_s19 + $0x8] sm:$0xff] (!%p308_p12)  ;;  %v385_v13 = vld [vmem:[%s316_s19 + $0x10] sm:$0xff] (!%p308_p12)  ;;  %vm686_vm2 = vcmask (!%p308_p12), 130048   ;;  %s1603_s16 = smov (!%p308_p12), [#allocation3]  }
  0x22   : > { %v1402_v14 = vpack.c.bf16 (!%p308_p12), %v384_v12, %v383_v11  ;;  %v386_v15 = vld [vmem:[%s316_s19 + $0x18] sm:$0xff] (!%p308_p12)  ;;  %1411 = vmatprep.subr.bf16.mxu1 (!%p308_p12), %v1410_v9  ;;  %v393_v49 = vld [vmem:[%s2057_s4] sm:$0x1] (!%p308_p12)  ;;  %s1540_s17 = sshll.u32 (!%p308_p12), %s1603_s16, 4  ;;  %s1541_s17 = int_to_ptr.vmem [resolvable:$false] %s1540_s17 }
  0x23   : > { %v1406_v16 = vpack.c.bf16 (!%p308_p12), %v386_v15, %v385_v13  ;;  %1413 = vmatpush3.bf16.msra.mxu1 (!%p308_p12), %v1410_v9  ;;  %s1542_s18 = scalar_lea.vmem (!%p308_p12), %s1541_s17, 512 }
  0x24   : > { %1403 = vmatprep.subr.bf16.mxu0 (!%p308_p12), %v1402_v14  ;;  %1415 = vmatprep.subr.bf16.mxu1 (!%p308_p12), %v1414_v10 }
  0x25   : > { %1405 = vmatpush3.bf16.msra.mxu0 (!%p308_p12), %v1402_v14 }
  0x26   : > { %s2076_s8 = smov (!%p356_p13, %s1240_s8), 63  ;;  %1407 = vmatprep.subr.bf16.mxu0 %v1406_v16 }
  0x27   : > { %s1241_s21 = sshll.u32 %s2076_s8, 3  ;;  %1417 = vmatpush3.bf16.msra.mxu1 %v1414_v10  ;;  %s1239_s8 = sshll.u32 %s1703_s20, 4 }
  0x28   : > { %s1731_s29 = scalar_lea.vmem %s2053_s0, %s1241_s21  ;;  %s1820_s22 = scalar_lea.vmem %s2059_s6, %s1241_s21 }
  0x29   : > { %v367_v17 = vld [vmem:[%s1731_s29] sm:$0xff]  ;;  %v368_v18 = vld [vmem:[%s1731_s29 + $0x8] sm:$0xff]  ;;  %v369_v19 = vld [vmem:[%s1731_s29 + $0x10] sm:$0xff]  ;;  %1409 = vmatpush3.bf16.msra.mxu0 %v1406_v16  ;;  %s354_s21 = scalar_lea.vmem [#allocation3], %s1239_s8 }
  0x2a   : > { %1336 = vmatprep.mubr.msk.f32.mxu1 %vm411_vm0, %v367_v17  ;;  %v370_v21 = vld [vmem:[%s1731_s29 + $0x18] sm:$0xff]  ;;  %v371_v22 = vld [vmem:[%s1731_s29 + $0x20] sm:$0xff]  ;;  %v372_v23 = vld [vmem:[%s1731_s29 + $0x28] sm:$0xff]  ;;  %1418 = vmatprep.subr.bf16.mxu0 %v1600_v34  ;;  %s1140_s23 = sshll.u32 %s354_s21, 4  ;;  %s2005_s23 = int_to_ptr.vmem [resolvable:$true] %s1140_s23 }
  0x2b   : > { %1337 = vmatmul.mubr.msk.f32.vlgmr.msra.gmra.mrb[0].mxu1 %vm411_vm0, %v368_v18  ;;  %v373_v24 = vld [vmem:[%s1731_s29 + $0x30] sm:$0xff]  ;;  %v374_v25 = vld [vmem:[%s1731_s29 + $0x38] sm:$0xff]  ;;  %v375_v26 = vld [vmem:[%s1731_s29 + $0x40] sm:$0xff]  ;;  %s1536_s15 = scalar_lea.vmem %s2005_s23, 256  ;;  %p1543_p3 = scmp.lt.s32.totalorder %s2005_s23, %s1541_s17 }
  0x2c   : > { %1339 = vmatprep.mubr.msk.f32.mxu1 %vm411_vm0, %v369_v19  ;;  %1326 = vmatmul.mubr.msk.f32.vlgmr.msra.gmra.mrb[0].mxu0 %vm411_vm0, %v392_v20  ;;  %v376_v27 = vld [vmem:[%s1731_s29 + $0x48] sm:$0xff]  ;;  %v377_v28 = vld [vmem:[%s1731_s29 + $0x50] sm:$0xff]  ;;  %v378_v29 = vld [vmem:[%s1731_s29 + $0x58] sm:$0xff]  ;;  %p1537_p0 = scmp.ne.s32.totalorder %s2005_s23, %s1536_s15  ;;  %p1544_p4 = scmp.lt.s32.totalorder %s1542_s18, %s1536_s15 }
  0x2d   : > { %v379_v30 = vld [vmem:[%s1731_s29 + $0x60] sm:$0xff]  ;;  %v380_v31 = vld [vmem:[%s1731_s29 + $0x68] sm:$0xff]  ;;  %v381_v32 = vld [vmem:[%s1731_s29 + $0x70] sm:$0xff]  ;;  %1364 = vmatprep.mubr.msk.f32.mxu0 %vm1601_vm1, %v1602_v35  ;;  %v830_v35 = vlaneseq }
  0x2e   : > { %v382_v33 = vld [vmem:[%s1731_s29 + $0x78] sm:$0xff]  ;;  %s1267_s29 = sshll.u32 %s1668_s28, 7  ;;  %s1128_s28 = scalar_lea.sflag [#allocation4], %s1703_s20 }
  0x2f   : > { %1340 = vmatmul.mubr.msk.f32.gmra.mrb[2].mxu1 %vm411_vm0, %v370_v21  ;;  %s2010_s14 = scalar_lea.hbm %s2060_s7, %s1267_s29  ;;  %p1538_p1 = pnand %p1537_p0, %p1686_p6 }
  0x30   : > { %1342 = vmatprep.mubr.msk.f32.mxu1 %vm411_vm0, %v371_v22  ;;  %p1545_p5 = por %p1544_p4, %p1543_p3 }
  0x31   : > { %p1539_p2 = pneg %p1538_p1 }
  0x33   : > { %1343 = vmatmul.mubr.msk.f32.gmra.mrb[4].mxu1 %vm411_vm0, %v372_v23  ;;  %p1546_p7 = pnand %p1545_p5, %p1539_p2 }
  0x34   : > { %1345 = vmatprep.mubr.msk.f32.mxu1 %vm411_vm0, %v373_v24 }
  0x37   : > { %1346 = vmatmul.mubr.msk.f32.gmra.mrb[6].mxu1 %vm411_vm0, %v374_v25 }
  0x38   : > { %1348 = vmatprep.mubr.msk.f32.mxu1 %vm411_vm0, %v375_v26 }
  0x3b   : > { %1349 = vmatmul.mubr.msk.f32.gmra.mrb[8].mxu1 %vm411_vm0, %v376_v27 }
  0x3c   : > { %1351 = vmatprep.mubr.msk.f32.mxu1 %vm411_vm0, %v377_v28 }
  0x3f   : > { %1352 = vmatmul.mubr.msk.f32.gmra.mrb[10].mxu1 %vm411_vm0, %v378_v29 }
  0x40   : > { %1354 = vmatprep.mubr.msk.f32.mxu1 %vm411_vm0, %v379_v30 }
  0x43   : > { %1355 = vmatmul.mubr.msk.f32.gmra.mrb[12].mxu1 %vm411_vm0, %v380_v31 }
  0x44   : > { %1357 = vmatprep.mubr.msk.f32.mxu1 %vm411_vm0, %v381_v32 }
  0x47   : > { %1358 = vmatmul.mubr.msk.f32.gmra.mrb[14].mxu1 %vm411_vm0, %v382_v33 }
  0xfe   : > { %v1338_v37 = vpop.f32.mrb[0].mxu1 }
  0xff   : > { %v767_v38 = vmul.f32 %v1338_v37, %v1772_v36  ;;  %v607_v39 = vpop.f32.mrb[1].mxu1  ;;  %v1775_v40 = vpop.f32.mrb[0].mxu0  ;;  %v831_v37 = vshrl.u32 %v830_v35, 7 }
 0x100   : > { %v766_v41 = vmul.f32 %v1772_v36, %v607_v39  ;;  %v484_v42 = vpop.f32.mrb[1].mxu0 }
 0x101   : > { %v785_v43 = vsel %vm686_vm2, %v767_v38, 0.0  ;;  %v1419_v44 = vpack.c.bf16 %v1775_v40, %v484_v42  ;;  %1399 = vmatprep.mubr.f32.mxu1 %v484_v42  ;;  %v398_v42 = vld [vmem:[%s1820_s22 + $0x18] sm:$0xff] }
 0x102   : > { %786 = vadd.xlane.f32.xlu0 %v785_v43  ;;  %v1341_v45 = vpop.f32.mrb[2].mxu1  ;;  %v782_v47 = vsel %vm686_vm2, %v766_v41, 0.0  ;;  %v832_v41 = vsub.s32 0, %v831_v37  ;;  %v402_v43 = vld [vmem:[%s1820_s22 + $0x38] sm:$0xff]  ;;  %vm901_vm3 = vcmp.gt.f32.partialorder %v398_v42, 0.0 }
 0x103   : > { %v769_v46 = vmul.f32 %v1341_v45, %v1772_v36  ;;  %v617_v48 = vpop.f32.mrb[3].mxu1  ;;  %1420 = vmatpush3.bf16.msra.mxu0 %v1419_v44  ;;  %v406_v44 = vld [vmem:[%s1820_s22 + $0x58] sm:$0xff]  ;;  %vm905_vm4 = vcmp.gt.f32.partialorder %v402_v43, 0.0 }
 0x104   : > { %v768_v50 = vmul.f32 %v1772_v36, %v617_v48  ;;  %v410_v45 = vld [vmem:[%s1820_s22 + $0x78] sm:$0xff]  ;;  %vm909_vm5 = vcmp.gt.f32.partialorder %v406_v44, 0.0 }
 0x105   : > { %v791_v51 = vsel %vm686_vm2, %v769_v46, 0.0  ;;  %vm913_vm6 = vcmp.gt.f32.partialorder %v410_v45, 0.0 }
 0x106   : > { %783 = vadd.xlane.f32.xlu0 %v782_v47  ;;  %792 = vadd.xlane.f32.xlu1 %v791_v51  ;;  %v1344_v52 = vpop.f32.mrb[4].mxu1  ;;  %v788_v54 = vsel %vm686_vm2, %v768_v50, 0.0 }
 0x107   : > { %1365 = vmatmul.mubr.msk.f32.vlgmr.msra.gmra.mrb[2].mxu0 %vm686_vm2, %v393_v49  ;;  %v771_v53 = vmul.f32 %v1344_v52, %v1772_v36  ;;  %v627_v55 = vpop.f32.mrb[5].mxu1 }
 0x108   : > { %v770_v56 = vmul.f32 %v1772_v36, %v627_v55 }
 0x109   : > { %v797_v60 = vsel %vm686_vm2, %v771_v53, 0.0 }
 0x10a   : > { %789 = vadd.xlane.f32.xlu1 %v788_v54  ;;  %v1347_v57 = vpop.f32.mrb[6].mxu1  ;;  %v794_v58 = vsel %vm686_vm2, %v770_v56, 0.0 }
 0x10b   : > { %v773_v59 = vmul.f32 %v1347_v57, %v1772_v36  ;;  %795 = vadd.xlane.f32.xlu0 %v794_v58  ;;  %v637_v61 = vpop.f32.mrb[7].mxu1 }
 0x10c   : > { %v772_v62 = vmul.f32 %v1772_v36, %v637_v61  ;;  %v1841_v61 = vld [vmem:[%s1820_s22 + $0x10] sm:$0xff] }
 0x10d   : > { %v803_v2 = vsel %vm686_vm2, %v773_v59, 0.0  ;;  %v1835_v59 = vld [vmem:[%s1820_s22] sm:$0xff] }
 0x10e   : > { %798 = vadd.xlane.f32.xlu1 %v797_v60  ;;  %v1350_v63 = vpop.f32.mrb[8].mxu1  ;;  %v800_v0 = vsel %vm686_vm2, %v772_v62, 0.0  ;;  %v1838_v60 = vld [vmem:[%s1820_s22 + $0x8] sm:$0xff]  ;;  %vm898_vm11 = vcmp.gt.f32.partialorder %v1835_v59, 0.0 }
 0x10f   : > { %v775_v1 = vmul.f32 %v1350_v63, %v1772_v36  ;;  %801 = vadd.xlane.f32.xlu0 %v800_v0  ;;  %v647_v3 = vpop.f32.mrb[9].mxu1 }
 0x110   : > { %v774_v4 = vmul.f32 %v1772_v36, %v647_v3  ;;  %v1846_v3 = vld [vmem:[%s1820_s22 + $0x20] sm:$0xff] }
 0x111   : > { %v809_v8 = vsel %vm686_vm2, %v775_v1, 0.0 }
 0x112   : > { %804 = vadd.xlane.f32.xlu1 %v803_v2  ;;  %v1353_v5 = vpop.f32.mrb[10].mxu1  ;;  %v806_v6 = vsel %vm686_vm2, %v774_v4, 0.0  ;;  %v1849_v4 = vld [vmem:[%s1820_s22 + $0x28] sm:$0xff] }
 0x113   : > { %v777_v7 = vmul.f32 %v1353_v5, %v1772_v36  ;;  %807 = vadd.xlane.f32.xlu0 %v806_v6  ;;  %v657_v9 = vpop.f32.mrb[11].mxu1  ;;  %v1852_v5 = vld [vmem:[%s1820_s22 + $0x30] sm:$0xff] }
 0x114   : > { %v776_v10 = vmul.f32 %v1772_v36, %v657_v9 }
 0x115   : > { %v815_v14 = vsel %vm686_vm2, %v777_v7, 0.0 }
 0x116   : > { %810 = vadd.xlane.f32.xlu1 %v809_v8  ;;  %v1356_v11 = vpop.f32.mrb[12].mxu1  ;;  %v812_v12 = vsel %vm686_vm2, %v776_v10, 0.0 }
 0x117   : > { %v779_v13 = vmul.f32 %v1356_v11, %v1772_v36  ;;  %813 = vadd.xlane.f32.xlu0 %v812_v12  ;;  %v667_v15 = vpop.f32.mrb[13].mxu1  ;;  %v1864_v12 = vld [vmem:[%s1820_s22 + $0x40] sm:$0xff] }
 0x118   : > { %v778_v16 = vmul.f32 %v1772_v36, %v667_v15 }
 0x119   : > { %v821_v20 = vsel %vm686_vm2, %v779_v13, 0.0  ;;  %v1867_v13 = vld [vmem:[%s1820_s22 + $0x48] sm:$0xff] }
 0x11a   : > { %816 = vadd.xlane.f32.xlu1 %v815_v14  ;;  %v1359_v17 = vpop.f32.mrb[14].mxu1  ;;  %v818_v18 = vsel %vm686_vm2, %v778_v16, 0.0  ;;  %v1870_v14 = vld [vmem:[%s1820_s22 + $0x50] sm:$0xff] }
 0x11b   : > { %v781_v19 = vmul.f32 %v1359_v17, %v1772_v36  ;;  %819 = vadd.xlane.f32.xlu0 %v818_v18  ;;  %v677_v21 = vpop.f32.mrb[15].mxu1 }
 0x11c   : > { %v780_v22 = vmul.f32 %v1772_v36, %v677_v21 }
 0x11d   : > { %v827_v24 = vsel %vm686_vm2, %v781_v19, 0.0 }
 0x11e   : > { %822 = vadd.xlane.f32.xlu1 %v821_v20  ;;  %v824_v23 = vsel %vm686_vm2, %v780_v22, 0.0 }
 0x11f   : > { %825 = vadd.xlane.f32.xlu0 %v824_v23  ;;  %v1888_v23 = vld [vmem:[%s1820_s22 + $0x60] sm:$0xff] }
 0x122   : > { %828 = vadd.xlane.f32.xlu1 %v827_v24  ;;  %v1891_v24 = vld [vmem:[%s1820_s22 + $0x68] sm:$0xff] }
 0x123   : > { %vm911_vm0 = vcmp.gt.f32.partialorder %v1891_v24, 0.0 }
 0x18f   : > { %v787_v27 = vpop.xlane.xlu0 %786 }
 0x193   : > { %v793_v25 = vpop.xlane.xlu1 %792  ;;  %v784_v29 = vpop.xlane.xlu0 %783 }
 0x197   : > { %v790_v26 = vpop.xlane.xlu1 %789 }
 0x198   : > { %v796_v31 = vpop.xlane.xlu0 %795 }
 0x19b   : > { %v799_v28 = vpop.xlane.xlu1 %798 }
 0x19c   : > { %v802_v33 = vpop.xlane.xlu0 %801 }
 0x19f   : > { %v805_v30 = vpop.xlane.xlu1 %804 }
 0x1a0   : > { %v808_v36 = vpop.xlane.xlu0 %807 }
 0x1a3   : > { %v811_v32 = vpop.xlane.xlu1 %810 }
 0x1a4   : > { %v814_v39 = vpop.xlane.xlu0 %813 }
 0x1a7   : > { %v817_v34 = vpop.xlane.xlu1 %816 }
 0x1a8   : > { %v820_v50 = vpop.xlane.xlu0 %819 }
 0x1ab   : > { %v1813_v38 = vpop.xlane.xlu1 %822 }
 0x1ac   : > { %v826_v15 = vpop.xlane.xlu0 %825 }
 0x1af   : > { %v829_v47 = vpop.xlane.xlu1 %828 }
 0x1da   : > { %v756_v46 = vpop.f32.mrb[2].mxu0 }
 0x1db   : > { %v833_v48 = vrot.slane %v756_v46, %v832_v41  ;;  %v1366_v49 = vpop.f32.mrb[3].mxu0 }
 0x1dd   : > { %v837_v51 = vadd.f32 %v833_v48, %v793_v25  ;;  %v841_v52 = vadd.f32 %v833_v48, %v805_v30  ;;  %v845_v53 = vadd.f32 %v833_v48, %v817_v34  ;;  %v849_v54 = vadd.f32 %v833_v48, %v829_v47  ;;  %v1894_v25 = vld [vmem:[%s1820_s22 + $0x70] sm:$0xff] }
 0x1de   : > { %v1826_v55 = vadd.f32 %v833_v48, %v784_v29  ;;  %v1828_v56 = vadd.f32 %v833_v48, %v787_v27  ;;  %v1830_v57 = vadd.f32 %v833_v48, %v790_v26  ;;  %v1832_v58 = vadd.f32 %v833_v48, %v796_v31 }
 0x1df   : > { %vm853_vm7 = vcmp.gt.f32.partialorder %v837_v51, 0.0  ;;  %vm857_vm8 = vcmp.gt.f32.partialorder %v841_v52, 0.0  ;;  %vm861_vm9 = vcmp.gt.f32.partialorder %v845_v53, 0.0  ;;  %vm865_vm10 = vcmp.gt.f32.partialorder %v849_v54, 0.0 }
 0x1e0   : > { %v869_v62 = vmul.f32 0.2, %v837_v51  ;;  %v873_v63 = vmul.f32 0.2, %v841_v52  ;;  %v877_v0 = vmul.f32 0.2, %v845_v53  ;;  %v1843_v1 = vadd.f32 %v833_v48, %v799_v28 }
 0x1e1   : > { %v881_v2 = vmul.f32 0.2, %v849_v54  ;;  %v1854_v6 = vadd.f32 %v833_v48, %v802_v33  ;;  %v1856_v7 = vadd.f32 %v833_v48, %v808_v36  ;;  %v1858_v8 = vadd.f32 %v833_v48, %v811_v32 }
 0x1e2   : > { %v885_v9 = vsel %vm853_vm7, %v837_v51, %v869_v62  ;;  %v889_v10 = vsel %vm857_vm8, %v841_v52, %v873_v63  ;;  %v893_v11 = vsel %vm861_vm9, %v845_v53, %v877_v0  ;;  %v844_v16 = vadd.f32 %v833_v48, %v814_v39 }
 0x1e3   : > { %v897_v17 = vsel %vm865_vm10, %v849_v54, %v881_v2  ;;  %v1874_v18 = vsel %vm901_vm3, %v885_v9, -9e+15  ;;  %v1877_v19 = vsel %vm905_vm4, %v889_v10, -9e+15  ;;  %v1880_v20 = vsel %vm909_vm5, %v893_v11, -9e+15 }
 0x1e4   : > { %v1883_v21 = vsel %vm913_vm6, %v897_v17, -9e+15  ;;  %v933_v22 = vmax.f32 %v1874_v18, %v1877_v19  ;;  %v846_v26 = vadd.f32 %v833_v48, %v820_v50  ;;  %v847_v27 = vadd.f32 %v833_v48, %v1813_v38 }
 0x1e5   : > { %v848_v28 = vadd.f32 %v833_v48, %v826_v15  ;;  %vm850_vm1 = vcmp.gt.f32.partialorder %v1826_v55, 0.0  ;;  %vm851_vm2 = vcmp.gt.f32.partialorder %v1828_v56, 0.0  ;;  %vm852_vm3 = vcmp.gt.f32.partialorder %v1830_v57, 0.0 }
 0x1e6   : > { %v1907_v29 = vmax.f32 %v933_v22, %v1880_v20  ;;  %vm854_vm7 = vcmp.gt.f32.partialorder %v1832_v58, 0.0  ;;  %vm855_vm8 = vcmp.gt.f32.partialorder %v1843_v1, 0.0  ;;  %vm856_vm9 = vcmp.gt.f32.partialorder %v1854_v6, 0.0 }
 0x1e7   : > { %vm910_vm10 = vcmp.gt.f32.partialorder %v1888_v23, 0.0  ;;  %vm912_vm15 = vcmp.gt.f32.partialorder %v1894_v25, 0.0  ;;  %vm858_vm14 = vcmp.gt.f32.partialorder %v1856_v7, 0.0  ;;  %vm859_vm4 = vcmp.gt.f32.partialorder %v1858_v8, 0.0 }
 0x1e8   : > { %vm860_vm13 = vcmp.gt.f32.partialorder %v844_v16, 0.0  ;;  %vm862_vm5 = vcmp.gt.f32.partialorder %v846_v26, 0.0  ;;  %v941_v30 = vmax.f32 %v1907_v29, %v1883_v21  ;;  %vm863_vm6 = vcmp.gt.f32.partialorder %v847_v27, 0.0 }
 0x1e9   : > { %vm864_vm12 = vcmp.gt.f32.partialorder %v848_v28, 0.0  ;;  %v866_v31 = vmul.f32 0.2, %v1826_v55  ;;  %v867_v32 = vmul.f32 0.2, %v1828_v56 }
 0x1ea   : > { %v868_v33 = vmul.f32 0.2, %v1830_v57  ;;  %v870_v34 = vmul.f32 0.2, %v1832_v58  ;;  %v871_v35 = vmul.f32 0.2, %v1843_v1 }
 0x1eb   : > { %v872_v36 = vmul.f32 0.2, %v1854_v6  ;;  %v874_v37 = vmul.f32 0.2, %v1856_v7  ;;  %v875_v38 = vmul.f32 0.2, %v1858_v8  ;;  %v882_v42 = vsel %vm850_vm1, %v1826_v55, %v866_v31 }
 0x1ec   : > { %v876_v39 = vmul.f32 0.2, %v844_v16  ;;  %v878_v41 = vmul.f32 0.2, %v846_v26  ;;  %v879_v43 = vmul.f32 0.2, %v847_v27  ;;  %v883_v45 = vsel %vm851_vm2, %v1828_v56, %v867_v32 }
 0x1ed   : > { %v880_v44 = vmul.f32 0.2, %v848_v28  ;;  %v884_v46 = vsel %vm852_vm3, %v1830_v57, %v868_v33  ;;  %v886_v47 = vsel %vm854_vm7, %v1832_v58, %v870_v34  ;;  %v887_v48 = vsel %vm855_vm8, %v1843_v1, %v871_v35 }
 0x1ee   : > { %v888_v49 = vsel %vm856_vm9, %v1854_v6, %v872_v36  ;;  %v890_v50 = vsel %vm858_vm14, %v1856_v7, %v874_v37  ;;  %v891_v51 = vsel %vm859_vm4, %v1858_v8, %v875_v38  ;;  %v892_v52 = vsel %vm860_vm13, %v844_v16, %v876_v39 }
 0x1ef   : > { %v894_v53 = vsel %vm862_vm5, %v846_v26, %v878_v41  ;;  %v895_v54 = vsel %vm863_vm6, %v847_v27, %v879_v43  ;;  %v896_v55 = vsel %vm864_vm12, %v848_v28, %v880_v44  ;;  %v914_v56 = vsel %vm898_vm11, %v882_v42, -9e+15 }
 0x1f0   : > { %vm2063_vm1 = vcmp.gt.f32.partialorder %v1838_v60, 0.0  ;;  %vm2064_vm14 = vcmp.gt.f32.partialorder %v1841_v61, 0.0  ;;  %vm2065_vm2 = vcmp.gt.f32.partialorder %v1846_v3, 0.0  ;;  %vm2066_vm13 = vcmp.gt.f32.partialorder %v1849_v4, 0.0 }
 0x1f1   : > { %v915_v57 = vsel %vm2063_vm1, %v883_v45, -9e+15  ;;  %v916_v58 = vsel %vm2064_vm14, %v884_v46, -9e+15  ;;  %v918_v62 = vsel %vm2065_vm2, %v886_v47, -9e+15 }
 0x1f2   : > { %v919_v63 = vsel %vm2066_vm13, %v887_v48, -9e+15  ;;  %vm2067_vm3 = vcmp.gt.f32.partialorder %v1852_v5, 0.0  ;;  %vm2068_vm12 = vcmp.gt.f32.partialorder %v1864_v12, 0.0  ;;  %vm2069_vm11 = vcmp.gt.f32.partialorder %v1867_v13, 0.0 }
 0x1f3   : > { %v920_v0 = vsel %vm2067_vm3, %v888_v49, -9e+15  ;;  %v922_v1 = vsel %vm2068_vm12, %v890_v50, -9e+15  ;;  %v923_v59 = vsel %vm2069_vm11, %v891_v51, -9e+15  ;;  %v930_v61 = vmax.f32 %v914_v56, %v918_v62 }
 0x1f4   : > { %vm2070_vm4 = vcmp.gt.f32.partialorder %v1870_v14, 0.0  ;;  %v1980_v2 = vsel %vm910_vm10, %v894_v53, -9e+15  ;;  %v1984_v3 = vsel %vm911_vm0, %v895_v54, -9e+15  ;;  %v931_v5 = vmax.f32 %v915_v57, %v919_v63 }
 0x1f5   : > { %v1976_v60 = vsel %vm2070_vm4, %v892_v52, -9e+15  ;;  %v1988_v4 = vsel %vm912_vm15, %v896_v55, -9e+15  ;;  %v932_v6 = vmax.f32 %v916_v58, %v920_v0  ;;  %v934_v7 = vmax.f32 %v930_v61, %v922_v1 }
 0x1f6   : > { %v935_v8 = vmax.f32 %v931_v5, %v923_v59 }
 0x1f7   : > { %v936_v9 = vmax.f32 %v932_v6, %v1976_v60  ;;  %v938_v10 = vmax.f32 %v934_v7, %v1980_v2 }
 0x1f8   : > { %v939_v11 = vmax.f32 %v935_v8, %v1984_v3 }
 0x1f9   : > { %v940_v12 = vmax.f32 %v936_v9, %v1988_v4 }
 0x1fa   : > { %v942_v13 = vmax.f32 %v938_v10, %v939_v11 }
 0x1fb   : > { %v943_v14 = vmax.f32 %v940_v12, %v941_v30 }
 0x1fd   : > { %v944_v15 = vmax.f32 %v942_v13, %v943_v14 }
 0x1ff   : > { %v945_v16 = vrot.slane %v944_v15, 4 }
 0x201   : > { %v946_v17 = vmax.f32 %v944_v15, %v945_v16 }
 0x203   : > { %v947_v22 = vrot.slane %v946_v17, 2 }
 0x205   : > { %v948_v23 = vmax.f32 %v946_v17, %v947_v22 }
 0x207   : > { %v949_v24 = vrot.slane %v948_v23, 1 }
 0x209   : > { %v950_v25 = vmax.f32 %v948_v23, %v949_v24 }
 0x20b   : > { %v953_v26 = vsub.f32 %v916_v58, %v950_v25  ;;  %v955_v27 = vsub.f32 %v918_v62, %v950_v25  ;;  %v956_v28 = vsub.f32 %v919_v63, %v950_v25  ;;  %v957_v29 = vsub.f32 %v920_v0, %v950_v25 }
 0x20c   : > { %v959_v31 = vsub.f32 %v922_v1, %v950_v25  ;;  %v960_v32 = vsub.f32 %v923_v59, %v950_v25  ;;  %v961_v33 = vsub.f32 %v1976_v60, %v950_v25  ;;  %v963_v34 = vsub.f32 %v1980_v2, %v950_v25 }
 0x20d   : > { %v964_v35 = vsub.f32 %v1984_v3, %v950_v25  ;;  %v965_v30 = vsub.f32 %v1988_v4, %v950_v25  ;;  %v951_v36 = vsub.f32 %v914_v56, %v950_v25  ;;  %v952_v37 = vsub.f32 %v915_v57, %v950_v25 }
 0x20e   : > { %v954_v38 = vsub.f32 %v1874_v18, %v950_v25  ;;  %v958_v39 = vsub.f32 %v1877_v19, %v950_v25  ;;  %v962_v41 = vsub.f32 %v1880_v20, %v950_v25  ;;  %v966_v42 = vsub.f32 %v1883_v21, %v950_v25 }
 0x20f   : > { %v967_v43 = vmul.f32 1.442695, %v951_v36  ;;  %v969_v44 = vmul.f32 1.442695, %v952_v37  ;;  %v971_v45 = vmul.f32 1.442695, %v953_v26 }
 0x210   : > { %v973_v46 = vmul.f32 1.442695, %v954_v38  ;;  %v975_v47 = vmul.f32 1.442695, %v955_v27  ;;  %v977_v48 = vmul.f32 1.442695, %v956_v28 }
 0x211   : > { %1498 = vpow2.f32 %v967_v43  ;;  %v979_v49 = vmul.f32 1.442695, %v957_v29  ;;  %v981_v18 = vmul.f32 1.442695, %v958_v39  ;;  %v983_v20 = vmul.f32 1.442695, %v959_v31 }
 0x212   : > { %1500 = vpow2.f32 %v969_v44  ;;  %v985_v52 = vmul.f32 1.442695, %v960_v32  ;;  %v987_v55 = vmul.f32 1.442695, %v961_v33  ;;  %v989_v58 = vmul.f32 1.442695, %v962_v41 }
 0x213   : > { %1502 = vpow2.f32 %v971_v45  ;;  %v991_v0 = vmul.f32 1.442695, %v963_v34  ;;  %v993_v60 = vmul.f32 1.442695, %v964_v35  ;;  %v995_v3 = vmul.f32 1.442695, %v965_v30 }
 0x214   : > { %1504 = vpow2.f32 %v973_v46  ;;  %v997_v6 = vmul.f32 1.442695, %v966_v42 }
 0x215   : > { %1506 = vpow2.f32 %v975_v47 }
 0x216   : > { %1508 = vpow2.f32 %v977_v48 }
 0x217   : > { %1510 = vpow2.f32 %v979_v49 }
 0x218   : > { %1512 = vpow2.f32 %v981_v18 }
 0x219   : > { %1514 = vpow2.f32 %v983_v20 }
 0x21a   : > { %1516 = vpow2.f32 %v985_v52 }
 0x21b   : > { %v1499_v50 = vpop.eup %1498  ;;  %1518 = vpow2.f32 %v987_v55 }
 0x21c   : > { %v1501_v19 = vpop.eup %1500  ;;  %1520 = vpow2.f32 %v989_v58 }
 0x21d   : > { %v999_v51 = vadd.f32 %v1501_v19, %v1499_v50  ;;  %v1503_v21 = vpop.eup %1502  ;;  %1522 = vpow2.f32 %v991_v0 }
 0x21e   : > { %v1505_v54 = vpop.eup %1504  ;;  %1524 = vpow2.f32 %v993_v60 }
 0x21f   : > { %v1000_v53 = vadd.f32 %v1503_v21, %v999_v51  ;;  %v1507_v57 = vpop.eup %1506  ;;  %1526 = vpow2.f32 %v995_v3 }
 0x220   : > { %v1509_v63 = vpop.eup %1508  ;;  %1528 = vpow2.f32 %v997_v6 }
 0x221   : > { %v1001_v56 = vadd.f32 %v1505_v54, %v1000_v53  ;;  %v1511_v59 = vpop.eup %1510 }
 0x222   : > { %v1513_v2 = vpop.eup %1512 }
 0x223   : > { %v1002_v62 = vadd.f32 %v1507_v57, %v1001_v56  ;;  %v1515_v5 = vpop.eup %1514 }
 0x224   : > { %v1517_v8 = vpop.eup %1516 }
 0x225   : > { %v1003_v1 = vadd.f32 %v1509_v63, %v1002_v62  ;;  %v1519_v10 = vpop.eup %1518 }
 0x226   : > { %v1521_v12 = vpop.eup %1520 }
 0x227   : > { %v1004_v61 = vadd.f32 %v1511_v59, %v1003_v1  ;;  %v1523_v14 = vpop.eup %1522 }
 0x228   : > { %v1525_v16 = vpop.eup %1524 }
 0x229   : > { %v1005_v4 = vadd.f32 %v1513_v2, %v1004_v61  ;;  %v1527_v22 = vpop.eup %1526 }
 0x22a   : > { %v1529_v24 = vpop.eup %1528 }
 0x22b   : > { %v1006_v7 = vadd.f32 %v1515_v5, %v1005_v4 }
 0x22d   : > { %v1007_v9 = vadd.f32 %v1517_v8, %v1006_v7 }
 0x22f   : > { %v1008_v11 = vadd.f32 %v1519_v10, %v1007_v9 }
 0x231   : > { %v1009_v13 = vadd.f32 %v1521_v12, %v1008_v11 }
 0x233   : > { %v1010_v15 = vadd.f32 %v1523_v14, %v1009_v13 }
 0x235   : > { %v1011_v17 = vadd.f32 %v1525_v16, %v1010_v15 }
 0x237   : > { %v1012_v23 = vadd.f32 %v1527_v22, %v1011_v17 }
 0x239   : > { %v1013_v25 = vadd.f32 %v1529_v24, %v1012_v23 }
 0x23b   : > { %v1014_v26 = vrot.slane %v1013_v25, 4 }
 0x23d   : > { %v1015_v27 = vadd.f32 %v1014_v26, %v1013_v25 }
 0x23f   : > { %v1016_v28 = vrot.slane %v1015_v27, 2 }
 0x241   : > { %v1017_v29 = vadd.f32 %v1016_v28, %v1015_v27 }
 0x243   : > { %v1018_v31 = vrot.slane %v1017_v29, 1 }
 0x245   : > { %v1019_v32 = vadd.f32 %v1018_v31, %v1017_v29 }
 0x247   : > { %1530 = vrcp.f32 %v1019_v32 }
 0x251   : > { %v1531_v33 = vpop.eup %1530 }
 0x252   : > { %v1022_v34 = vmul.f32 %v1531_v33, %v1499_v50  ;;  %v1023_v35 = vmul.f32 %v1531_v33, %v1501_v19  ;;  %v1024_v30 = vmul.f32 %v1531_v33, %v1503_v21  ;;  %v1025_v36 = vmul.f32 %v1531_v33, %v1505_v54 }
 0x253   : > { %v1026_v37 = vmul.f32 %v1531_v33, %v1507_v57  ;;  %v1027_v38 = vmul.f32 %v1531_v33, %v1509_v63  ;;  %v1028_v39 = vmul.f32 %v1531_v33, %v1511_v59  ;;  %v1029_v41 = vmul.f32 %v1531_v33, %v1513_v2 }
 0x254   : > { %v1421_v42 = vpack.c.bf16 %v1023_v35, %v1022_v34  ;;  %v1425_v43 = vpack.c.bf16 %v1025_v36, %v1024_v30  ;;  %v1030_v44 = vmul.f32 %v1531_v33, %v1515_v5  ;;  %v1031_v45 = vmul.f32 %v1531_v33, %v1517_v8 }
 0x255   : > { %v1429_v46 = vpack.c.bf16 %v1027_v38, %v1026_v37  ;;  %v1433_v47 = vpack.c.bf16 %v1029_v41, %v1028_v39  ;;  %v1032_v48 = vmul.f32 %v1531_v33, %v1519_v10  ;;  %v1033_v49 = vmul.f32 %v1531_v33, %v1521_v12 }
 0x256   : > { %1422 = vmatprep.subr.bf16.mxu1 %v1421_v42  ;;  %v1437_v18 = vpack.c.bf16 %v1031_v45, %v1030_v44  ;;  %v1034_v20 = vmul.f32 %v1531_v33, %v1523_v14  ;;  %v1035_v51 = vmul.f32 %v1531_v33, %v1525_v16  ;;  %v1036_v50 = vmul.f32 %v1531_v33, %v1527_v22 }
 0x257   : > { %1424 = vmatpush3.bf16.msra.mxu1 %v1421_v42  ;;  %v1441_v19 = vpack.c.bf16 %v1033_v49, %v1032_v48  ;;  %v1037_v21 = vmul.f32 %v1531_v33, %v1529_v24 }
 0x258   : > { %1426 = vmatprep.subr.bf16.mxu1 %v1425_v43  ;;  %v1445_v52 = vpack.c.bf16 %v1035_v51, %v1034_v20 }
 0x259   : > { %v1449_v53 = vpack.c.bf16 %v1037_v21, %v1036_v50 }
 0x25b   : > { %1428 = vmatpush3.bf16.msra.mxu1 %v1425_v43 }
 0x25c   : > { %1430 = vmatprep.subr.bf16.mxu1 %v1429_v46 }
 0x25f   : > { %1432 = vmatpush3.bf16.msra.mxu1 %v1429_v46 }
 0x260   : > { %1434 = vmatprep.subr.bf16.mxu1 %v1433_v47 }
 0x263   : > { %1436 = vmatpush3.bf16.msra.mxu1 %v1433_v47 }
 0x264   : > { %1438 = vmatprep.subr.bf16.mxu1 %v1437_v18 }
 0x267   : > { %1440 = vmatpush3.bf16.msra.mxu1 %v1437_v18 }
 0x268   : > { %1442 = vmatprep.subr.bf16.mxu1 %v1441_v19 }
 0x26b   : > { %1444 = vmatpush3.bf16.msra.mxu1 %v1441_v19 }
 0x26c   : > { %1446 = vmatprep.subr.bf16.mxu1 %v1445_v52 }
 0x26f   : > { %1448 = vmatpush3.bf16.msra.mxu1 %v1445_v52 }
 0x270   : > { %1450 = vmatprep.subr.bf16.mxu1 %v1449_v53 }
 0x273   : > { %1452 = vmatpush3.bf16.msra.mxu1 %v1449_v53 }
 0x276   : > { %1400 = vmatmul.mubr.f32.vlgmr.msra.gmra.mrb[16].mxu1 %v1775_v40 }
 0x349   : > { %v1401_v54 = vpop.f32.mrb[16].mxu1 }
 0x34a   : > { %v1116_v55 = vmin.f32 %v1401_v54, 0.0  ;;  %v1104_v56 = vpop.f32.mrb[17].mxu1  ;;  %vm1114_vm15 = vcmp.gt.f32.partialorder %v1401_v54, 0.0 }
 0x34b   : > { %v1115_v57 = vmin.f32 %v1104_v56, 0.0  ;;  %vm1113_vm0 = vcmp.gt.f32.partialorder %v1104_v56, 0.0 }
 0x34c   : > { %v1119_v58 = vmul.f32 1.442695, %v1116_v55 }
 0x34d   : > { %v1117_v62 = vmul.f32 1.442695, %v1115_v57 }
 0x34e   : > { %1532 = vpow2.f32 %v1119_v58 }
 0x34f   : > { %1534 = vpow2.f32 %v1117_v62 }
 0x358   : > { %v1533_v63 = vpop.eup %1532 }
 0x359   : > { %v1535_v0 = vpop.eup %1534  ;;  %v1265_v1 = vadd.f32 -1.0, %v1533_v63 }
 0x35a   : > { %v1264_v40 = vadd.f32 -1.0, %v1535_v0 }
 0x35b   : > { %v1124_v59 = vsel %vm1114_vm15, %v1401_v54, %v1265_v1 }
 0x35c   : > { %1126 = vst [vmem:[%s354_s21 + $0x8] sm:$0xff] %v1124_v59  ;;  %v1123_v60 = vsel %vm1113_vm0, %v1104_v56, %v1264_v40 }
 0x35d   : > { %1125 = vst [vmem:[%s354_s21] sm:$0xff] %v1123_v60 }
 0x35e   : > { %1549 = shalt.err (!%p1546_p7)
}
 0x35f   : > { %s1550_s19 = scalar_lea.hbm %s2010_s14, 256  ;;  %s1554_s21 = scalar_lea.hbm %s2060_s7, 1024 }
 0x360   : > { %p1551_p9 = scmp.ne.s32.totalorder %s2010_s14, %s1550_s19  ;;  %p1555_p12 = scmp.lt.u32.totalorder %s2010_s14, %s2060_s7 }
 0x361   : > { %p1556_p13 = scmp.lt.u32.totalorder %s1554_s21, %s1550_s19  ;;  %p1558_p1 = scmp.lt.u32.totalorder %s1550_s19, %s2010_s14 }
 0x362   : > { %p1552_p10 = pnand %p1551_p9, %p1686_p6 }
 0x363   : > { %p1557_p0 = por %p1556_p13, %p1555_p12 }
 0x364   : > { %p1553_p11 = pneg %p1552_p10 }
 0x365   : > { %p1559_p2 = por %p1558_p1, %p1557_p0 }
 0x367   : > { %p1560_p3 = pnand %p1559_p2, %p1553_p11 }
 0x369   : > { %1563 = shalt.err (!%p1560_p3)
}
 0x36a   : > { %s1604_s13 = smov 128   ;;  %s1605_s15 = smov 512  }
 0x36b   : > { %s1606_s16 = smov 8  }
 0x36c   : > { %1453 = dma.vmem_to_hbm [thread:$0]  (%p1686_p6), %s2005_s23, 256, %s2010_s14, %s1128_s28, %s1604_s13, %s1605_s15, %s1606_s16  }
 0x36d PF: > { %p1459_p4 = scmp.ge.s32.totalorder %s1598_s27, 2  ;;  %s1155_s17 = sand.u32 1, %s1586_s24  }
 0x36e   : > { %s1156_s18 = scalar_lea.sflag [#allocation4], %s1155_s17 }
 0x36f   : > { %p1456_p5 = pnand %p1459_p4, %p1690_p8 }
 0x371   : > { %1581 = dma.done.wait (!%p1456_p5), %s1156_s18, 256  }
 0x372   : > { %1583 = vsyncadd (!%p1456_p5), %s1156_s18, 4294967040  ;;  %p17_p7 = scmp.ge.s32.totalorder %s1672_s30, 6   ;;  %s2071_s24 = smov %s1590_s25 }
 0x373   : > { %s2072_s25 = smov %s1594_s26  ;;  %s2073_s26 = smov %s1684_s10 }
 0x374   : > { %s2074_s27 = smov %s1672_s30  ;;  %19 = sbr.rel (!%p17_p7) target bundleno = 3 (0x3), region = 132 }
 0x37b   :  { %1161 = vsyncpa [#allocation4], 1 }
 0x37c   :  { %1163 = vsyncpa [#allocation4 + $0x1], 1 }

</bundles_post_ra>
